<compile_context>
chip_gen: v7x
topology: tpu7x:2x2x1
jax: 0.10.0
libtpu: 0.0.40
codegen_flags: <defaults>
</compile_context>

<pallas_src>
import functools

import jax
import jax.numpy as jnp
from jax.experimental import pallas as pl
from jax.experimental.pallas import tpu as pltpu

LN_EPS = 1e-5
NEG_INF = -1e30                      # additive causal mask value
VMEM_LIMIT = 48 * 1024 * 1024        # > default scoped limits, < v7x 64 MiB physical


def _tile(n, targets):
    """Pick the largest target tile that divides n, else use the full dimension."""
    for t in targets:
        if n % t == 0:
            return t
    return n


def _layernorm(x, g, b, eps=LN_EPS):
    mu = jnp.mean(x, axis=-1, keepdims=True)
    var = jnp.mean((x - mu) ** 2, axis=-1, keepdims=True)
    return (x - mu) * jax.lax.rsqrt(var + eps) * g + b


# ----------------------------- Pallas kernels -----------------------------
def ln_matmul_kernel(x_ref, g_ref, b_ref, w_ref, bias_ref, o_ref):
    # y = LayerNorm(x) @ W + bias   (LN stats f32, matmul operands bf16, f32 accumulate)
    h = _layernorm(x_ref[...], g_ref[0], b_ref[0])
    y = jnp.dot(h.astype(jnp.bfloat16), w_ref[...],
                preferred_element_type=jnp.float32) + bias_ref[0]
    o_ref[...] = y.astype(o_ref.dtype)


def ln_logits_kernel(x_ref, g_ref, b_ref, wt_ref, o_ref):
    # logits tile = LayerNorm(x) @ emb_t tile   (tied weights, bias-free)
    h = _layernorm(x_ref[...], g_ref[0], b_ref[0])
    o_ref[...] = jnp.dot(h.astype(jnp.bfloat16), wt_ref[...],
                         preferred_element_type=jnp.float32)


def attention_kernel(q_ref, k_ref, v_ref, o_ref):
    # One (batch, head, query-tile) step of causal softmax attention.
    q = q_ref[...]                    # (tq, Dh) bf16, already scaled by 1/sqrt(Dh)
    k = k_ref[...]                    # (S,  Dh) bf16
    v = v_ref[...]                    # (S,  Dh) bf16
    tq, S = q.shape[0], k.shape[0]
    s = jax.lax.dot_general(q, k, (((1,), (1,)), ((), ())),
                            preferred_element_type=jnp.float32)        # (tq, S) f32
    row = pl.program_id(2) * tq + jax.lax.broadcasted_iota(jnp.int32, (tq, S), 0)
    col = jax.lax.broadcasted_iota(jnp.int32, (tq, S), 1)
    s = jnp.where(col > row, NEG_INF, s)          # causal mask generated in-kernel
    s = s - jnp.max(s, axis=-1, keepdims=True)
    p = jnp.exp(s)
    p = p * pl.reciprocal(jnp.sum(p, axis=-1, keepdims=True), approx=True)
    o = jnp.dot(p.astype(jnp.bfloat16), v, preferred_element_type=jnp.float32)
    o_ref[...] = o.astype(o_ref.dtype)


def post_attn_kernel(x_ref, attn_ref, wo_ref, bo_ref, g2_ref, be2_ref,
                     w1_ref, b1_ref, w2_ref, b2_ref, o_ref):
    # x += attn @ Wo + bo ;  x += MLP(LN2(x))   (residual stream kept in f32)
    x = x_ref[...]
    x = x + jnp.dot(attn_ref[...], wo_ref[...],
                    preferred_element_type=jnp.float32) + bo_ref[0]
    h = _layernorm(x, g2_ref[0], be2_ref[0]).astype(jnp.bfloat16)
    ff = jnp.dot(h, w1_ref[...], preferred_element_type=jnp.float32) + b1_ref[0]
    # TODO(synk): PyTorch nn.GELU() default is exact erf GELU; tanh approximation used
    # because erf lowering in Mosaic is not guaranteed.
    ff = jax.nn.gelu(ff, approximate=True).astype(jnp.bfloat16)
    y = jnp.dot(ff, w2_ref[...], preferred_element_type=jnp.float32) + b2_ref[0]
    o_ref[...] = x + y


# ----------------------------- pallas_call wrappers -----------------------------
def _cparams(sem):
    return pltpu.CompilerParams(dimension_semantics=sem, vmem_limit_bytes=VMEM_LIMIT)


def run_ln_matmul(x2, g, b, w_t, bias, out_dtype):
    M, D = x2.shape
    N = w_t.shape[1]
    tm = _tile(M, (256, 128))
    tn = _tile(N, (512, 256, 128))
    return pl.pallas_call(
        ln_matmul_kernel,
        out_shape=jax.ShapeDtypeStruct((M, N), out_dtype),
        grid=(M // tm, N // tn),
        in_specs=[
            pl.BlockSpec((tm, D), lambda i, j: (i, 0)),
            pl.BlockSpec((1, D), lambda i, j: (0, 0)),
            pl.BlockSpec((1, D), lambda i, j: (0, 0)),
            pl.BlockSpec((D, tn), lambda i, j: (0, j)),
            pl.BlockSpec((1, tn), lambda i, j: (0, j)),
        ],
        out_specs=pl.BlockSpec((tm, tn), lambda i, j: (i, j)),
        compiler_params=_cparams(("parallel", "parallel")),
    )(x2, g, b, w_t, bias)


def run_attention(q, k, v):
    B, H, S, Dh = q.shape
    tq = _tile(S, (256, 128))
    return pl.pallas_call(
        attention_kernel,
        out_shape=jax.ShapeDtypeStruct((B, H, S, Dh), jnp.bfloat16),
        grid=(B, H, S // tq),
        in_specs=[
            pl.BlockSpec((None, None, tq, Dh), lambda b, h, i: (b, h, i, 0)),
            pl.BlockSpec((None, None, S, Dh), lambda b, h, i: (b, h, 0, 0)),
            pl.BlockSpec((None, None, S, Dh), lambda b, h, i: (b, h, 0, 0)),
        ],
        out_specs=pl.BlockSpec((None, None, tq, Dh), lambda b, h, i: (b, h, i, 0)),
        compiler_params=_cparams(("parallel", "parallel", "parallel")),
    )(q, k, v)


def run_post_attn(x2, attn, blk):
    M, D = x2.shape
    F = blk["w1_t"].shape[1]
    tm = _tile(M, (256, 128))
    full2 = lambda shape: pl.BlockSpec(shape, lambda i: (0, 0))
    return pl.pallas_call(
        post_attn_kernel,
        out_shape=jax.ShapeDtypeStruct((M, D), jnp.float32),
        grid=(M // tm,),
        in_specs=[
            pl.BlockSpec((tm, D), lambda i: (i, 0)),     # residual stream x (f32)
            pl.BlockSpec((tm, D), lambda i: (i, 0)),     # attention output (bf16)
            full2((D, D)), full2((1, D)),                # out-proj weight / bias
            full2((1, D)), full2((1, D)),                # ln2 gamma / beta
            full2((D, F)), full2((1, F)),                # mlp fc1 / bias
            full2((F, D)), full2((1, D)),                # mlp fc2 / bias
        ],
        out_specs=pl.BlockSpec((tm, D), lambda i: (i, 0)),
        compiler_params=_cparams(("parallel",)),
    )(x2, attn, blk["wo_t"], blk["bo"], blk["ln2g"], blk["ln2b"],
      blk["w1_t"], blk["b1"], blk["w2_t"], blk["b2"])


def run_logits(x2, g, b, emb_t):
    M, D = x2.shape
    V = emb_t.shape[1]
    tm = _tile(M, (256, 128))
    tv = _tile(V, (512, 256, 128))
    return pl.pallas_call(
        ln_logits_kernel,
        out_shape=jax.ShapeDtypeStruct((M, V), jnp.float32),
        grid=(M // tm, V // tv),
        in_specs=[
            pl.BlockSpec((tm, D), lambda i, j: (i, 0)),
            pl.BlockSpec((1, D), lambda i, j: (0, 0)),
            pl.BlockSpec((1, D), lambda i, j: (0, 0)),
            pl.BlockSpec((D, tv), lambda i, j: (0, j)),
        ],
        out_specs=pl.BlockSpec((tm, tv), lambda i, j: (i, j)),
        compiler_params=_cparams(("parallel", "parallel")),
    )(x2, g, b, emb_t)


# ----------------------------- model glue -----------------------------
def prep_params(params, num_heads):
    """One-time kernel-side parameter prep: bf16 weight casts, pre-transposed tied
    embedding (D, V), and 1/sqrt(Dh) folded into the q projection weights/bias."""
    D = params["tok_emb"].shape[1]
    scale = 1.0 / float(D // num_heads) ** 0.5
    fp = {
        "tok_emb": params["tok_emb"],                          # f32 gather table
        "pos_emb": params["pos_emb"],
        "emb_t": params["tok_emb"].T.astype(jnp.bfloat16),     # (D, V) bf16, tied
        "lnfg": params["lnfg"], "lnfb": params["lnfb"],
        "blocks": [],
    }
    for blk in params["blocks"]:
        wqkv = blk["wqkv_t"].at[:, :D].multiply(scale)
        bqkv = blk["bqkv"].at[:, :D].multiply(scale)
        fp["blocks"].append({
            "ln1g": blk["ln1g"], "ln1b": blk["ln1b"],
            "wqkv_t": wqkv.astype(jnp.bfloat16), "bqkv": bqkv,
            "wo_t": blk["wo_t"].astype(jnp.bfloat16), "bo": blk["bo"],
            "ln2g": blk["ln2g"], "ln2b": blk["ln2b"],
            "w1_t": blk["w1_t"].astype(jnp.bfloat16), "b1": blk["b1"],
            "w2_t": blk["w2_t"].astype(jnp.bfloat16), "b2": blk["b2"],
        })
    return fp


@functools.partial(jax.jit, static_argnums=2)
def gpt2_forward(fparams, input_ids, num_heads):
    B, S = input_ids.shape
    D = fparams["tok_emb"].shape[1]
    Dh = D // num_heads
    # embedding lookup (gather) + learned positions: plain-JAX glue
    x = (jnp.take(fparams["tok_emb"], input_ids, axis=0)
         + fparams["pos_emb"][:S][None, :, :])                            # (B, S, D) f32
    for blk in fparams["blocks"]:
        x2 = x.reshape(B * S, D)
        qkv = run_ln_matmul(x2, blk["ln1g"], blk["ln1b"],
                            blk["wqkv_t"], blk["bqkv"], jnp.bfloat16)     # (M, 3D) bf16
        qkv = qkv.reshape(B, S, 3, num_heads, Dh)
        q = jnp.transpose(qkv[:, :, 0], (0, 2, 1, 3))                     # (B, H, S, Dh)
        k = jnp.transpose(qkv[:, :, 1], (0, 2, 1, 3))
        v = jnp.transpose(qkv[:, :, 2], (0, 2, 1, 3))
        o = run_attention(q, k, v)                                        # (B, H, S, Dh)
        attn = jnp.transpose(o, (0, 2, 1, 3)).reshape(B * S, D)           # head concat
        x = run_post_attn(x2, attn, blk).reshape(B, S, D)
    logits = run_logits(x.reshape(B * S, D), fparams["lnfg"], fparams["lnfb"],
                        fparams["emb_t"])
    return logits.reshape(B, S, -1)


def init_params(key, V, D, H, L, F, max_seq):
    ks = iter(jax.random.split(key, 2 + 8 * L))
    w = lambda shape, s=0.02: s * jax.random.normal(next(ks), shape, jnp.float32)
    params = {
        "tok_emb": w((V, D)),
        "pos_emb": w((max_seq, D)),
        "blocks": [],
        "lnfg": jnp.ones((1, D), jnp.float32),
        "lnfb": jnp.zeros((1, D), jnp.float32),
    }
    for _ in range(L):
        params["blocks"].append({
            "ln1g": jnp.ones((1, D), jnp.float32),
            "ln1b": jnp.zeros((1, D), jnp.float32),
            "wqkv_t": w((D, 3 * D)),
            "bqkv": w((1, 3 * D), 0.01),
            "wo_t": w((D, D)),
            "bo": w((1, D), 0.01),
            "ln2g": jnp.ones((1, D), jnp.float32),
            "ln2b": jnp.zeros((1, D), jnp.float32),
            "w1_t": w((D, F)),
            "b1": w((1, F), 0.01),
            "w2_t": w((F, D)),
            "b2": w((1, D), 0.01),
        })
    return params


# pure-JAX f32 reference (same math, same GELU approximation) for correctness check
def reference_forward(params, input_ids, num_heads):
    B, S = input_ids.shape
    D = params["tok_emb"].shape[1]
    Dh = D // num_heads
    x = jnp.take(params["tok_emb"], input_ids, axis=0) + params["pos_emb"][:S][None]
    idx = jnp.arange(S)
    mask = jnp.where(idx[None, :] > idx[:, None], NEG_INF, 0.0).astype(jnp.float32)
    for blk in params["blocks"]:
        h = _layernorm(x, blk["ln1g"][0], blk["ln1b"][0])
        qkv = h @ blk["wqkv_t"] + blk["bqkv"][0]
        q, k, v = qkv[..., :D], qkv[..., D:2 * D], qkv[..., 2 * D:]
        q = q.reshape(B, S, num_heads, Dh).transpose(0, 2, 1, 3) * (1.0 / Dh ** 0.5)
        k = k.reshape(B, S, num_heads, Dh).transpose(0, 2, 1, 3)
        v = v.reshape(B, S, num_heads, Dh).transpose(0, 2, 1, 3)
        s = jnp.einsum("bhqd,bhkd->bhqk", q, k) + mask
        p = jax.nn.softmax(s, axis=-1)
        o = jnp.einsum("bhqk,bhkd->bhqd", p, v).transpose(0, 2, 1, 3).reshape(B, S, D)
        x = x + (o @ blk["wo_t"] + blk["bo"][0])
        h2 = _layernorm(x, blk["ln2g"][0], blk["ln2b"][0])
        ff = jax.nn.gelu(h2 @ blk["w1_t"] + blk["b1"][0], approximate=True)
        x = x + (ff @ blk["w2_t"] + blk["b2"][0])
    x = _layernorm(x, params["lnfg"][0], params["lnfb"][0])
    return jnp.einsum("bsd,vd->bsv", x, params["tok_emb"])


if __name__ == "__main__":
    # small config consistent with GPT2Simple (vocab, d_model, heads, layers, d_ff, max_seq_len)
    V, D, H, L, F, MAXS = 256, 64, 4, 2, 128, 16
    B, S = 2, 8

    key = jax.random.PRNGKey(0)
    pkey, ikey = jax.random.split(key)
    params = init_params(pkey, V, D, H, L, F, MAXS)
    input_ids = jax.random.randint(ikey, (B, S), 0, V, dtype=jnp.int32)

    fparams = prep_params(params, H)
    logits = gpt2_forward(fparams, input_ids, H)
    jax.block_until_ready(logits)
    assert logits.shape == (B, S, V), logits.shape
    assert logits.dtype == jnp.float32

    ref = reference_forward(params, input_ids, H)
    max_err = float(jnp.max(jnp.abs(logits - ref)))
    # bf16 MXU operands (f32 accumulation) vs. the all-f32 reference -> small mismatch
    assert max_err < 5e-2, f"mismatch vs reference: {max_err}"

    print("KERNEL_OK")
</pallas_src>

<mosaic_0001>
module attributes {stable_mosaic.version = 11 : i64} {
  func.func @ln_matmul_kernel(%arg0: i32, %arg1: i32, %arg2: memref<16x64xf32, #tpu.memory_space<vmem>>, %arg3: memref<1x64xf32, #tpu.memory_space<vmem>>, %arg4: memref<1x64xf32, #tpu.memory_space<vmem>>, %arg5: memref<64x192xbf16, #tpu.memory_space<vmem>>, %arg6: memref<1x192xf32, #tpu.memory_space<vmem>>, %arg7: memref<16x192xbf16, #tpu.memory_space<vmem>>) attributes {dimension_semantics = [#tpu.dimension_semantics<parallel>, #tpu.dimension_semantics<parallel>], iteration_bounds = array<i64: 1, 1>, scalar_prefetch = 0 : i64, scratch_operands = 0 : i64, tpu.core_type = #tpu.core_type<tc>, window_params = [{transform_indices = @transform_0, window_bounds = array<i64: 16, 64>}, {pipeline_mode = #tpu.pipeline_mode<synchronous>, transform_indices = @transform_1, window_bounds = array<i64: 1, 64>}, {pipeline_mode = #tpu.pipeline_mode<synchronous>, transform_indices = @transform_2, window_bounds = array<i64: 1, 64>}, {transform_indices = @transform_3, window_bounds = array<i64: 64, 192>}, {transform_indices = @transform_4, window_bounds = array<i64: 1, 192>}, {transform_indices = @transform_5, window_bounds = array<i64: 16, 192>}]} {
    %c0 = arith.constant 0 : index
    %c0_0 = arith.constant 0 : index
    %0 = vector.load %arg2[%c0, %c0_0] : memref<16x64xf32, #tpu.memory_space<vmem>>, vector<16x64xf32>
    %c0_1 = arith.constant 0 : index
    %c0_2 = arith.constant 0 : index
    %1 = vector.load %arg3[%c0_1, %c0_2] : memref<1x64xf32, #tpu.memory_space<vmem>>, vector<1x64xf32>
    %2 = vector.shape_cast %1 : vector<1x64xf32> to vector<64xf32>
    %c0_3 = arith.constant 0 : index
    %c0_4 = arith.constant 0 : index
    %3 = vector.load %arg4[%c0_3, %c0_4] : memref<1x64xf32, #tpu.memory_space<vmem>>, vector<1x64xf32>
    %4 = vector.shape_cast %3 : vector<1x64xf32> to vector<64xf32>
    %cst = arith.constant dense<0.000000e+00> : vector<16xf32>
    %5 = vector.multi_reduction <add>, %0, %cst [1] : vector<16x64xf32> to vector<16xf32>
    %6 = vector.shape_cast %5 : vector<16xf32> to vector<16x1xf32>
    %cst_5 = arith.constant 6.400000e+01 : f32
    %7 = vector.broadcast %cst_5 : f32 to vector<16x1xf32>
    %8 = arith.divf %6, %7 : vector<16x1xf32>
    %9 = vector.broadcast %8 : vector<16x1xf32> to vector<16x64xf32>
    %10 = arith.subf %0, %9 : vector<16x64xf32>
    %11 = arith.mulf %10, %10 : vector<16x64xf32>
    %cst_6 = arith.constant dense<0.000000e+00> : vector<16xf32>
    %12 = vector.multi_reduction <add>, %11, %cst_6 [1] : vector<16x64xf32> to vector<16xf32>
    %13 = vector.shape_cast %12 : vector<16xf32> to vector<16x1xf32>
    %cst_7 = arith.constant 6.400000e+01 : f32
    %14 = vector.broadcast %cst_7 : f32 to vector<16x1xf32>
    %15 = arith.divf %13, %14 : vector<16x1xf32>
    %16 = vector.broadcast %8 : vector<16x1xf32> to vector<16x64xf32>
    %17 = arith.subf %0, %16 : vector<16x64xf32>
    %cst_8 = arith.constant 9.99999974E-6 : f32
    %18 = vector.broadcast %cst_8 : f32 to vector<16x1xf32>
    %19 = arith.addf %15, %18 : vector<16x1xf32>
    %20 = math.rsqrt %19 : vector<16x1xf32>
    %21 = vector.broadcast %20 : vector<16x1xf32> to vector<16x64xf32>
    %22 = arith.mulf %17, %21 : vector<16x64xf32>
    %23 = vector.shape_cast %2 : vector<64xf32> to vector<1x64xf32>
    %24 = vector.broadcast %23 : vector<1x64xf32> to vector<16x64xf32>
    %25 = arith.mulf %22, %24 : vector<16x64xf32>
    %26 = vector.shape_cast %4 : vector<64xf32> to vector<1x64xf32>
    %27 = vector.broadcast %26 : vector<1x64xf32> to vector<16x64xf32>
    %28 = arith.addf %25, %27 : vector<16x64xf32>
    %29 = arith.truncf %28 : vector<16x64xf32> to vector<16x64xbf16>
    %c0_9 = arith.constant 0 : index
    %c0_10 = arith.constant 0 : index
    %30 = vector.load %arg5[%c0_9, %c0_10] : memref<64x192xbf16, #tpu.memory_space<vmem>>, vector<64x192xbf16>
    %cst_11 = arith.constant dense<0.000000e+00> : vector<16x192xf32>
    %31 = tpu.matmul %29, %30, %cst_11 {dimension_numbers = #tpu.dot_dimension_numbers<[1], [0], [0], [1], [0, 0, 1, 1], [], []>} : vector<16x64xbf16>, vector<64x192xbf16>, vector<16x192xf32> -> vector<16x192xf32>
    %c0_12 = arith.constant 0 : index
    %c0_13 = arith.constant 0 : index
    %32 = vector.load %arg6[%c0_12, %c0_13] : memref<1x192xf32, #tpu.memory_space<vmem>>, vector<1x192xf32>
    %33 = vector.shape_cast %32 : vector<1x192xf32> to vector<192xf32>
    %34 = vector.shape_cast %33 : vector<192xf32> to vector<1x192xf32>
    %35 = vector.broadcast %34 : vector<1x192xf32> to vector<16x192xf32>
    %36 = arith.addf %31, %35 : vector<16x192xf32>
    %37 = arith.truncf %36 : vector<16x192xf32> to vector<16x192xbf16>
    %c0_14 = arith.constant 0 : index
    %c0_15 = arith.constant 0 : index
    %38 = vector.load %arg7[%c0_14, %c0_15] : memref<16x192xbf16, #tpu.memory_space<vmem>>, vector<16x192xbf16>
    tpu.vector_store %arg7[%c0_14, %c0_15], %37 {strides = array<i32>} : memref<16x192xbf16, #tpu.memory_space<vmem>>, vector<16x192xbf16>,
    return
  }
  func.func @transform_0(%arg0: i32, %arg1: i32) -> (i32, i32) {
    %c0_i32 = arith.constant 0 : i32
    %c0_i32_0 = arith.constant 0 : i32
    return %arg0, %c0_i32 : i32, i32
  }
  func.func @transform_1(%arg0: i32, %arg1: i32) -> (i32, i32) {
    %c0_i32 = arith.constant 0 : i32
    %c0_i32_0 = arith.constant 0 : i32
    %c0_i32_1 = arith.constant 0 : i32
    return %c0_i32, %c0_i32_0 : i32, i32
  }
  func.func @transform_2(%arg0: i32, %arg1: i32) -> (i32, i32) {
    %c0_i32 = arith.constant 0 : i32
    %c0_i32_0 = arith.constant 0 : i32
    %c0_i32_1 = arith.constant 0 : i32
    return %c0_i32, %c0_i32_0 : i32, i32
  }
  func.func @transform_3(%arg0: i32, %arg1: i32) -> (i32, i32) {
    %c0_i32 = arith.constant 0 : i32
    %c0_i32_0 = arith.constant 0 : i32
    return %c0_i32, %arg1 : i32, i32
  }
  func.func @transform_4(%arg0: i32, %arg1: i32) -> (i32, i32) {
    %c0_i32 = arith.constant 0 : i32
    %c0_i32_0 = arith.constant 0 : i32
    return %c0_i32, %arg1 : i32, i32
  }
  func.func @transform_5(%arg0: i32, %arg1: i32) -> (i32, i32) {
    %c0_i32 = arith.constant 0 : i32
    return %arg0, %arg1 : i32, i32
  }
}

module attributes {stable_mosaic.version = 11 : i64} {
  func.func @attention_kernel(%arg0: i32, %arg1: i32, %arg2: i32, %arg3: memref<1x1x8x16xbf16, #tpu.memory_space<vmem>>, %arg4: memref<1x1x8x16xbf16, #tpu.memory_space<vmem>>, %arg5: memref<1x1x8x16xbf16, #tpu.memory_space<vmem>>, %arg6: memref<1x1x8x16xbf16, #tpu.memory_space<vmem>>) attributes {dimension_semantics = [#tpu.dimension_semantics<parallel>, #tpu.dimension_semantics<parallel>, #tpu.dimension_semantics<parallel>], iteration_bounds = array<i64: 2, 4, 1>, scalar_prefetch = 0 : i64, scratch_operands = 0 : i64, tpu.core_type = #tpu.core_type<tc>, window_params = [{transform_indices = @transform_0, window_bounds = array<i64: 1, 1, 8, 16>}, {transform_indices = @transform_1, window_bounds = array<i64: 1, 1, 8, 16>}, {transform_indices = @transform_2, window_bounds = array<i64: 1, 1, 8, 16>}, {transform_indices = @transform_3, window_bounds = array<i64: 1, 1, 8, 16>}]} {
    %c0 = arith.constant 0 : index
    %c0_0 = arith.constant 0 : index
    %c0_1 = arith.constant 0 : index
    %c0_2 = arith.constant 0 : index
    %0 = vector.load %arg3[%c0, %c0_0, %c0_1, %c0_2] : memref<1x1x8x16xbf16, #tpu.memory_space<vmem>>, vector<1x1x8x16xbf16>
    %1 = vector.shape_cast %0 : vector<1x1x8x16xbf16> to vector<8x16xbf16>
    %c0_3 = arith.constant 0 : index
    %c0_4 = arith.constant 0 : index
    %c0_5 = arith.constant 0 : index
    %c0_6 = arith.constant 0 : index
    %2 = vector.load %arg4[%c0_3, %c0_4, %c0_5, %c0_6] : memref<1x1x8x16xbf16, #tpu.memory_space<vmem>>, vector<1x1x8x16xbf16>
    %3 = vector.shape_cast %2 : vector<1x1x8x16xbf16> to vector<8x16xbf16>
    %c0_7 = arith.constant 0 : index
    %c0_8 = arith.constant 0 : index
    %c0_9 = arith.constant 0 : index
    %c0_10 = arith.constant 0 : index
    %4 = vector.load %arg5[%c0_7, %c0_8, %c0_9, %c0_10] : memref<1x1x8x16xbf16, #tpu.memory_space<vmem>>, vector<1x1x8x16xbf16>
    %5 = vector.shape_cast %4 : vector<1x1x8x16xbf16> to vector<8x16xbf16>
    %cst = arith.constant dense<0.000000e+00> : vector<8x8xf32>
    %6 = tpu.matmul %1, %3, %cst {dimension_numbers = #tpu.dot_dimension_numbers<[1], [1], [0], [0], [0, 0, 1, 0], [], []>} : vector<8x16xbf16>, vector<8x16xbf16>, vector<8x8xf32> -> vector<8x8xf32>
    %c8_i32 = arith.constant 8 : i32
    %7 = arith.muli %arg2, %c8_i32 : i32
    %8 = tpu.iota {dimensions = array<i32: 0>} : vector<8x8xi32>
    %9 = vector.broadcast %7 : i32 to vector<8x8xi32>
    %10 = arith.addi %9, %8 : vector<8x8xi32>
    %11 = tpu.iota {dimensions = array<i32: 1>} : vector<8x8xi32>
    %12 = arith.cmpi sgt, %11, %10 : vector<8x8xi32>
    %cst_11 = arith.constant -1.000000e+30 : f32
    %13 = vector.broadcast %cst_11 : f32 to vector<8x8xf32>
    %14 = arith.select %12, %13, %6 : vector<8x8xi1>, vector<8x8xf32>
    %cst_12 = arith.constant dense<0xFF800000> : vector<8xf32>
    %15 = vector.multi_reduction <maximumf>, %14, %cst_12 [1] : vector<8x8xf32> to vector<8xf32>
    %16 = vector.shape_cast %15 : vector<8xf32> to vector<8x1xf32>
    %17 = vector.broadcast %16 : vector<8x1xf32> to vector<8x8xf32>
    %18 = arith.subf %14, %17 : vector<8x8xf32>
    %19 = math.exp %18 : vector<8x8xf32>
    %cst_13 = arith.constant dense<0.000000e+00> : vector<8xf32>
    %20 = vector.multi_reduction <add>, %19, %cst_13 [1] : vector<8x8xf32> to vector<8xf32>
    %21 = vector.shape_cast %20 : vector<8xf32> to vector<8x1xf32>
    %22 = tpu.reciprocal %21 {approx = true} : vector<8x1xf32> -> vector<8x1xf32>
    %23 = vector.broadcast %22 : vector<8x1xf32> to vector<8x8xf32>
    %24 = arith.mulf %19, %23 : vector<8x8xf32>
    %25 = arith.truncf %24 : vector<8x8xf32> to vector<8x8xbf16>
    %cst_14 = arith.constant dense<0.000000e+00> : vector<8x16xf32>
    %26 = tpu.matmul %25, %5, %cst_14 {dimension_numbers = #tpu.dot_dimension_numbers<[1], [0], [0], [1], [0, 0, 1, 1], [], []>} : vector<8x8xbf16>, vector<8x16xbf16>, vector<8x16xf32> -> vector<8x16xf32>
    %27 = arith.truncf %26 : vector<8x16xf32> to vector<8x16xbf16>
    %c0_15 = arith.constant 0 : index
    %c0_16 = arith.constant 0 : index
    %c0_17 = arith.constant 0 : index
    %c0_18 = arith.constant 0 : index
    %28 = vector.load %arg6[%c0_15, %c0_16, %c0_17, %c0_18] : memref<1x1x8x16xbf16, #tpu.memory_space<vmem>>, vector<1x1x8x16xbf16>
    %29 = vector.shape_cast %28 : vector<1x1x8x16xbf16> to vector<8x16xbf16>
    %30 = vector.shape_cast %27 : vector<8x16xbf16> to vector<1x1x8x16xbf16>
    tpu.vector_store %arg6[%c0_15, %c0_16, %c0_17, %c0_18], %30 {strides = array<i32>} : memref<1x1x8x16xbf16, #tpu.memory_space<vmem>>, vector<1x1x8x16xbf16>,
    return
  }
  func.func @transform_0(%arg0: i32, %arg1: i32, %arg2: i32) -> (i32, i32, i32, i32) {
    %c0_i32 = arith.constant 0 : i32
    %c0_i32_0 = arith.constant 0 : i32
    return %arg0, %arg1, %arg2, %c0_i32 : i32, i32, i32, i32
  }
  func.func @transform_1(%arg0: i32, %arg1: i32, %arg2: i32) -> (i32, i32, i32, i32) {
    %c0_i32 = arith.constant 0 : i32
    %c0_i32_0 = arith.constant 0 : i32
    %c0_i32_1 = arith.constant 0 : i32
    return %arg0, %arg1, %c0_i32, %c0_i32_0 : i32, i32, i32, i32
  }
  func.func @transform_2(%arg0: i32, %arg1: i32, %arg2: i32) -> (i32, i32, i32, i32) {
    %c0_i32 = arith.constant 0 : i32
    %c0_i32_0 = arith.constant 0 : i32
    %c0_i32_1 = arith.constant 0 : i32
    return %arg0, %arg1, %c0_i32, %c0_i32_0 : i32, i32, i32, i32
  }
  func.func @transform_3(%arg0: i32, %arg1: i32, %arg2: i32) -> (i32, i32, i32, i32) {
    %c0_i32 = arith.constant 0 : i32
    %c0_i32_0 = arith.constant 0 : i32
    return %arg0, %arg1, %arg2, %c0_i32 : i32, i32, i32, i32
  }
}

module attributes {stable_mosaic.version = 11 : i64} {
  func.func @post_attn_kernel(%arg0: i32, %arg1: memref<16x64xf32, #tpu.memory_space<vmem>>, %arg2: memref<16x64xbf16, #tpu.memory_space<vmem>>, %arg3: memref<64x64xbf16, #tpu.memory_space<vmem>>, %arg4: memref<1x64xf32, #tpu.memory_space<vmem>>, %arg5: memref<1x64xf32, #tpu.memory_space<vmem>>, %arg6: memref<1x64xf32, #tpu.memory_space<vmem>>, %arg7: memref<64x128xbf16, #tpu.memory_space<vmem>>, %arg8: memref<1x128xf32, #tpu.memory_space<vmem>>, %arg9: memref<128x64xbf16, #tpu.memory_space<vmem>>, %arg10: memref<1x64xf32, #tpu.memory_space<vmem>>, %arg11: memref<16x64xf32, #tpu.memory_space<vmem>>) attributes {dimension_semantics = [#tpu.dimension_semantics<parallel>], iteration_bounds = array<i64: 1>, scalar_prefetch = 0 : i64, scratch_operands = 0 : i64, tpu.core_type = #tpu.core_type<tc>, window_params = [{transform_indices = @transform_0, window_bounds = array<i64: 16, 64>}, {transform_indices = @transform_1, window_bounds = array<i64: 16, 64>}, {pipeline_mode = #tpu.pipeline_mode<synchronous>, transform_indices = @transform_2, window_bounds = array<i64: 64, 64>}, {pipeline_mode = #tpu.pipeline_mode<synchronous>, transform_indices = @transform_3, window_bounds = array<i64: 1, 64>}, {pipeline_mode = #tpu.pipeline_mode<synchronous>, transform_indices = @transform_4, window_bounds = array<i64: 1, 64>}, {pipeline_mode = #tpu.pipeline_mode<synchronous>, transform_indices = @transform_5, window_bounds = array<i64: 1, 64>}, {pipeline_mode = #tpu.pipeline_mode<synchronous>, transform_indices = @transform_6, window_bounds = array<i64: 64, 128>}, {pipeline_mode = #tpu.pipeline_mode<synchronous>, transform_indices = @transform_7, window_bounds = array<i64: 1, 128>}, {pipeline_mode = #tpu.pipeline_mode<synchronous>, transform_indices = @transform_8, window_bounds = array<i64: 128, 64>}, {pipeline_mode = #tpu.pipeline_mode<synchronous>, transform_indices = @transform_9, window_bounds = array<i64: 1, 64>}, {transform_indices = @transform_10, window_bounds = array<i64: 16, 64>}]} {
    %c0 = arith.constant 0 : index
    %c0_0 = arith.constant 0 : index
    %0 = vector.load %arg1[%c0, %c0_0] : memref<16x64xf32, #tpu.memory_space<vmem>>, vector<16x64xf32>
    %c0_1 = arith.constant 0 : index
    %c0_2 = arith.constant 0 : index
    %1 = vector.load %arg2[%c0_1, %c0_2] : memref<16x64xbf16, #tpu.memory_space<vmem>>, vector<16x64xbf16>
    %c0_3 = arith.constant 0 : index
    %c0_4 = arith.constant 0 : index
    %2 = vector.load %arg3[%c0_3, %c0_4] : memref<64x64xbf16, #tpu.memory_space<vmem>>, vector<64x64xbf16>
    %cst = arith.constant dense<0.000000e+00> : vector<16x64xf32>
    %3 = tpu.matmul %1, %2, %cst {dimension_numbers = #tpu.dot_dimension_numbers<[1], [0], [0], [1], [0, 0, 1, 1], [], []>} : vector<16x64xbf16>, vector<64x64xbf16>, vector<16x64xf32> -> vector<16x64xf32>
    %4 = arith.addf %0, %3 : vector<16x64xf32>
    %c0_5 = arith.constant 0 : index
    %c0_6 = arith.constant 0 : index
    %5 = vector.load %arg4[%c0_5, %c0_6] : memref<1x64xf32, #tpu.memory_space<vmem>>, vector<1x64xf32>
    %6 = vector.shape_cast %5 : vector<1x64xf32> to vector<64xf32>
    %7 = vector.shape_cast %6 : vector<64xf32> to vector<1x64xf32>
    %8 = vector.broadcast %7 : vector<1x64xf32> to vector<16x64xf32>
    %9 = arith.addf %4, %8 : vector<16x64xf32>
    %c0_7 = arith.constant 0 : index
    %c0_8 = arith.constant 0 : index
    %10 = vector.load %arg5[%c0_7, %c0_8] : memref<1x64xf32, #tpu.memory_space<vmem>>, vector<1x64xf32>
    %11 = vector.shape_cast %10 : vector<1x64xf32> to vector<64xf32>
    %c0_9 = arith.constant 0 : index
    %c0_10 = arith.constant 0 : index
    %12 = vector.load %arg6[%c0_9, %c0_10] : memref<1x64xf32, #tpu.memory_space<vmem>>, vector<1x64xf32>
    %13 = vector.shape_cast %12 : vector<1x64xf32> to vector<64xf32>
    %cst_11 = arith.constant dense<0.000000e+00> : vector<16xf32>
    %14 = vector.multi_reduction <add>, %9, %cst_11 [1] : vector<16x64xf32> to vector<16xf32>
    %15 = vector.shape_cast %14 : vector<16xf32> to vector<16x1xf32>
    %cst_12 = arith.constant 6.400000e+01 : f32
    %16 = vector.broadcast %cst_12 : f32 to vector<16x1xf32>
    %17 = arith.divf %15, %16 : vector<16x1xf32>
    %18 = vector.broadcast %17 : vector<16x1xf32> to vector<16x64xf32>
    %19 = arith.subf %9, %18 : vector<16x64xf32>
    %20 = arith.mulf %19, %19 : vector<16x64xf32>
    %cst_13 = arith.constant dense<0.000000e+00> : vector<16xf32>
    %21 = vector.multi_reduction <add>, %20, %cst_13 [1] : vector<16x64xf32> to vector<16xf32>
    %22 = vector.shape_cast %21 : vector<16xf32> to vector<16x1xf32>
    %cst_14 = arith.constant 6.400000e+01 : f32
    %23 = vector.broadcast %cst_14 : f32 to vector<16x1xf32>
    %24 = arith.divf %22, %23 : vector<16x1xf32>
    %25 = vector.broadcast %17 : vector<16x1xf32> to vector<16x64xf32>
    %26 = arith.subf %9, %25 : vector<16x64xf32>
    %cst_15 = arith.constant 9.99999974E-6 : f32
    %27 = vector.broadcast %cst_15 : f32 to vector<16x1xf32>
    %28 = arith.addf %24, %27 : vector<16x1xf32>
    %29 = math.rsqrt %28 : vector<16x1xf32>
    %30 = vector.broadcast %29 : vector<16x1xf32> to vector<16x64xf32>
    %31 = arith.mulf %26, %30 : vector<16x64xf32>
    %32 = vector.shape_cast %11 : vector<64xf32> to vector<1x64xf32>
    %33 = vector.broadcast %32 : vector<1x64xf32> to vector<16x64xf32>
    %34 = arith.mulf %31, %33 : vector<16x64xf32>
    %35 = vector.shape_cast %13 : vector<64xf32> to vector<1x64xf32>
    %36 = vector.broadcast %35 : vector<1x64xf32> to vector<16x64xf32>
    %37 = arith.addf %34, %36 : vector<16x64xf32>
    %38 = arith.truncf %37 : vector<16x64xf32> to vector<16x64xbf16>
    %c0_16 = arith.constant 0 : index
    %c0_17 = arith.constant 0 : index
    %39 = vector.load %arg7[%c0_16, %c0_17] : memref<64x128xbf16, #tpu.memory_space<vmem>>, vector<64x128xbf16>
    %cst_18 = arith.constant dense<0.000000e+00> : vector<16x128xf32>
    %40 = tpu.matmul %38, %39, %cst_18 {dimension_numbers = #tpu.dot_dimension_numbers<[1], [0], [0], [1], [0, 0, 1, 1], [], []>} : vector<16x64xbf16>, vector<64x128xbf16>, vector<16x128xf32> -> vector<16x128xf32>
    %c0_19 = arith.constant 0 : index
    %c0_20 = arith.constant 0 : index
    %41 = vector.load %arg8[%c0_19, %c0_20] : memref<1x128xf32, #tpu.memory_space<vmem>>, vector<1x128xf32>
    %42 = vector.shape_cast %41 : vector<1x128xf32> to vector<128xf32>
    %43 = vector.shape_cast %42 : vector<128xf32> to vector<1x128xf32>
    %44 = vector.broadcast %43 : vector<1x128xf32> to vector<16x128xf32>
    %45 = arith.addf %40, %44 : vector<16x128xf32>
    %46 = arith.mulf %45, %45 : vector<16x128xf32>
    %47 = arith.mulf %45, %46 : vector<16x128xf32>
    %cst_21 = arith.constant 4.471500e-02 : f32
    %48 = vector.broadcast %cst_21 : f32 to vector<16x128xf32>
    %49 = arith.mulf %48, %47 : vector<16x128xf32>
    %50 = arith.addf %45, %49 : vector<16x128xf32>
    %cst_22 = arith.constant 0.797884583 : f32
    %51 = vector.broadcast %cst_22 : f32 to vector<16x128xf32>
    %52 = arith.mulf %51, %50 : vector<16x128xf32>
    %53 = math.tanh %52 : vector<16x128xf32>
    %cst_23 = arith.constant 1.000000e+00 : f32
    %54 = vector.broadcast %cst_23 : f32 to vector<16x128xf32>
    %55 = arith.addf %54, %53 : vector<16x128xf32>
    %cst_24 = arith.constant 5.000000e-01 : f32
    %56 = vector.broadcast %cst_24 : f32 to vector<16x128xf32>
    %57 = arith.mulf %56, %55 : vector<16x128xf32>
    %58 = arith.mulf %45, %57 : vector<16x128xf32>
    %59 = arith.truncf %58 : vector<16x128xf32> to vector<16x128xbf16>
    %c0_25 = arith.constant 0 : index
    %c0_26 = arith.constant 0 : index
    %60 = vector.load %arg9[%c0_25, %c0_26] : memref<128x64xbf16, #tpu.memory_space<vmem>>, vector<128x64xbf16>
    %cst_27 = arith.constant dense<0.000000e+00> : vector<16x64xf32>
    %61 = tpu.matmul %59, %60, %cst_27 {dimension_numbers = #tpu.dot_dimension_numbers<[1], [0], [0], [1], [0, 0, 1, 1], [], []>} : vector<16x128xbf16>, vector<128x64xbf16>, vector<16x64xf32> -> vector<16x64xf32>
    %c0_28 = arith.constant 0 : index
    %c0_29 = arith.constant 0 : index
    %62 = vector.load %arg10[%c0_28, %c0_29] : memref<1x64xf32, #tpu.memory_space<vmem>>, vector<1x64xf32>
    %63 = vector.shape_cast %62 : vector<1x64xf32> to vector<64xf32>
    %64 = vector.shape_cast %63 : vector<64xf32> to vector<1x64xf32>
    %65 = vector.broadcast %64 : vector<1x64xf32> to vector<16x64xf32>
    %66 = arith.addf %61, %65 : vector<16x64xf32>
    %67 = arith.addf %9, %66 : vector<16x64xf32>
    %c0_30 = arith.constant 0 : index
    %c0_31 = arith.constant 0 : index
    %68 = vector.load %arg11[%c0_30, %c0_31] : memref<16x64xf32, #tpu.memory_space<vmem>>, vector<16x64xf32>
    tpu.vector_store %arg11[%c0_30, %c0_31], %67 {strides = array<i32>} : memref<16x64xf32, #tpu.memory_space<vmem>>, vector<16x64xf32>,
    return
  }
  func.func @transform_0(%arg0: i32) -> (i32, i32) {
    %c0_i32 = arith.constant 0 : i32
    %c0_i32_0 = arith.constant 0 : i32
    return %arg0, %c0_i32 : i32, i32
  }
  func.func @transform_1(%arg0: i32) -> (i32, i32) {
    %c0_i32 = arith.constant 0 : i32
    %c0_i32_0 = arith.constant 0 : i32
    return %arg0, %c0_i32 : i32, i32
  }
  func.func @transform_2(%arg0: i32) -> (i32, i32) {
    %c0_i32 = arith.constant 0 : i32
    %c0_i32_0 = arith.constant 0 : i32
    %c0_i32_1 = arith.constant 0 : i32
    return %c0_i32, %c0_i32_0 : i32, i32
  }
  func.func @transform_3(%arg0: i32) -> (i32, i32) {
    %c0_i32 = arith.constant 0 : i32
    %c0_i32_0 = arith.constant 0 : i32
    %c0_i32_1 = arith.constant 0 : i32
    return %c0_i32, %c0_i32_0 : i32, i32
  }
  func.func @transform_4(%arg0: i32) -> (i32, i32) {
    %c0_i32 = arith.constant 0 : i32
    %c0_i32_0 = arith.constant 0 : i32
    %c0_i32_1 = arith.constant 0 : i32
    return %c0_i32, %c0_i32_0 : i32, i32
  }
  func.func @transform_5(%arg0: i32) -> (i32, i32) {
    %c0_i32 = arith.constant 0 : i32
    %c0_i32_0 = arith.constant 0 : i32
    %c0_i32_1 = arith.constant 0 : i32
    return %c0_i32, %c0_i32_0 : i32, i32
  }
  func.func @transform_6(%arg0: i32) -> (i32, i32) {
    %c0_i32 = arith.constant 0 : i32
    %c0_i32_0 = arith.constant 0 : i32
    %c0_i32_1 = arith.constant 0 : i32
    return %c0_i32, %c0_i32_0 : i32, i32
  }
  func.func @transform_7(%arg0: i32) -> (i32, i32) {
    %c0_i32 = arith.constant 0 : i32
    %c0_i32_0 = arith.constant 0 : i32
    %c0_i32_1 = arith.constant 0 : i32
    return %c0_i32, %c0_i32_0 : i32, i32
  }
  func.func @transform_8(%arg0: i32) -> (i32, i32) {
    %c0_i32 = arith.constant 0 : i32
    %c0_i32_0 = arith.constant 0 : i32
    %c0_i32_1 = arith.constant 0 : i32
    return %c0_i32, %c0_i32_0 : i32, i32
  }
  func.func @transform_9(%arg0: i32) -> (i32, i32) {
    %c0_i32 = arith.constant 0 : i32
    %c0_i32_0 = arith.constant 0 : i32
    %c0_i32_1 = arith.constant 0 : i32
    return %c0_i32, %c0_i32_0 : i32, i32
  }
  func.func @transform_10(%arg0: i32) -> (i32, i32) {
    %c0_i32 = arith.constant 0 : i32
    %c0_i32_0 = arith.constant 0 : i32
    return %arg0, %c0_i32 : i32, i32
  }
}

module attributes {stable_mosaic.version = 11 : i64} {
  func.func @ln_logits_kernel(%arg0: i32, %arg1: i32, %arg2: memref<16x64xf32, #tpu.memory_space<vmem>>, %arg3: memref<1x64xf32, #tpu.memory_space<vmem>>, %arg4: memref<1x64xf32, #tpu.memory_space<vmem>>, %arg5: memref<64x256xbf16, #tpu.memory_space<vmem>>, %arg6: memref<16x256xf32, #tpu.memory_space<vmem>>) attributes {dimension_semantics = [#tpu.dimension_semantics<parallel>, #tpu.dimension_semantics<parallel>], iteration_bounds = array<i64: 1, 1>, scalar_prefetch = 0 : i64, scratch_operands = 0 : i64, tpu.core_type = #tpu.core_type<tc>, window_params = [{transform_indices = @transform_0, window_bounds = array<i64: 16, 64>}, {pipeline_mode = #tpu.pipeline_mode<synchronous>, transform_indices = @transform_1, window_bounds = array<i64: 1, 64>}, {pipeline_mode = #tpu.pipeline_mode<synchronous>, transform_indices = @transform_2, window_bounds = array<i64: 1, 64>}, {transform_indices = @transform_3, window_bounds = array<i64: 64, 256>}, {transform_indices = @transform_4, window_bounds = array<i64: 16, 256>}]} {
    %c0 = arith.constant 0 : index
    %c0_0 = arith.constant 0 : index
    %0 = vector.load %arg2[%c0, %c0_0] : memref<16x64xf32, #tpu.memory_space<vmem>>, vector<16x64xf32>
    %c0_1 = arith.constant 0 : index
    %c0_2 = arith.constant 0 : index
    %1 = vector.load %arg3[%c0_1, %c0_2] : memref<1x64xf32, #tpu.memory_space<vmem>>, vector<1x64xf32>
    %2 = vector.shape_cast %1 : vector<1x64xf32> to vector<64xf32>
    %c0_3 = arith.constant 0 : index
    %c0_4 = arith.constant 0 : index
    %3 = vector.load %arg4[%c0_3, %c0_4] : memref<1x64xf32, #tpu.memory_space<vmem>>, vector<1x64xf32>
    %4 = vector.shape_cast %3 : vector<1x64xf32> to vector<64xf32>
    %cst = arith.constant dense<0.000000e+00> : vector<16xf32>
    %5 = vector.multi_reduction <add>, %0, %cst [1] : vector<16x64xf32> to vector<16xf32>
    %6 = vector.shape_cast %5 : vector<16xf32> to vector<16x1xf32>
    %cst_5 = arith.constant 6.400000e+01 : f32
    %7 = vector.broadcast %cst_5 : f32 to vector<16x1xf32>
    %8 = arith.divf %6, %7 : vector<16x1xf32>
    %9 = vector.broadcast %8 : vector<16x1xf32> to vector<16x64xf32>
    %10 = arith.subf %0, %9 : vector<16x64xf32>
    %11 = arith.mulf %10, %10 : vector<16x64xf32>
    %cst_6 = arith.constant dense<0.000000e+00> : vector<16xf32>
    %12 = vector.multi_reduction <add>, %11, %cst_6 [1] : vector<16x64xf32> to vector<16xf32>
    %13 = vector.shape_cast %12 : vector<16xf32> to vector<16x1xf32>
    %cst_7 = arith.constant 6.400000e+01 : f32
    %14 = vector.broadcast %cst_7 : f32 to vector<16x1xf32>
    %15 = arith.divf %13, %14 : vector<16x1xf32>
    %16 = vector.broadcast %8 : vector<16x1xf32> to vector<16x64xf32>
    %17 = arith.subf %0, %16 : vector<16x64xf32>
    %cst_8 = arith.constant 9.99999974E-6 : f32
    %18 = vector.broadcast %cst_8 : f32 to vector<16x1xf32>
    %19 = arith.addf %15, %18 : vector<16x1xf32>
    %20 = math.rsqrt %19 : vector<16x1xf32>
    %21 = vector.broadcast %20 : vector<16x1xf32> to vector<16x64xf32>
    %22 = arith.mulf %17, %21 : vector<16x64xf32>
    %23 = vector.shape_cast %2 : vector<64xf32> to vector<1x64xf32>
    %24 = vector.broadcast %23 : vector<1x64xf32> to vector<16x64xf32>
    %25 = arith.mulf %22, %24 : vector<16x64xf32>
    %26 = vector.shape_cast %4 : vector<64xf32> to vector<1x64xf32>
    %27 = vector.broadcast %26 : vector<1x64xf32> to vector<16x64xf32>
    %28 = arith.addf %25, %27 : vector<16x64xf32>
    %29 = arith.truncf %28 : vector<16x64xf32> to vector<16x64xbf16>
    %c0_9 = arith.constant 0 : index
    %c0_10 = arith.constant 0 : index
    %30 = vector.load %arg5[%c0_9, %c0_10] : memref<64x256xbf16, #tpu.memory_space<vmem>>, vector<64x256xbf16>
    %cst_11 = arith.constant dense<0.000000e+00> : vector<16x256xf32>
    %31 = tpu.matmul %29, %30, %cst_11 {dimension_numbers = #tpu.dot_dimension_numbers<[1], [0], [0], [1], [0, 0, 1, 1], [], []>} : vector<16x64xbf16>, vector<64x256xbf16>, vector<16x256xf32> -> vector<16x256xf32>
    %c0_12 = arith.constant 0 : index
    %c0_13 = arith.constant 0 : index
    %32 = vector.load %arg6[%c0_12, %c0_13] : memref<16x256xf32, #tpu.memory_space<vmem>>, vector<16x256xf32>
    tpu.vector_store %arg6[%c0_12, %c0_13], %31 {strides = array<i32>} : memref<16x256xf32, #tpu.memory_space<vmem>>, vector<16x256xf32>,
    return
  }
  func.func @transform_0(%arg0: i32, %arg1: i32) -> (i32, i32) {
    %c0_i32 = arith.constant 0 : i32
    %c0_i32_0 = arith.constant 0 : i32
    return %arg0, %c0_i32 : i32, i32
  }
  func.func @transform_1(%arg0: i32, %arg1: i32) -> (i32, i32) {
    %c0_i32 = arith.constant 0 : i32
    %c0_i32_0 = arith.constant 0 : i32
    %c0_i32_1 = arith.constant 0 : i32
    return %c0_i32, %c0_i32_0 : i32, i32
  }
  func.func @transform_2(%arg0: i32, %arg1: i32) -> (i32, i32) {
    %c0_i32 = arith.constant 0 : i32
    %c0_i32_0 = arith.constant 0 : i32
    %c0_i32_1 = arith.constant 0 : i32
    return %c0_i32, %c0_i32_0 : i32, i32
  }
  func.func @transform_3(%arg0: i32, %arg1: i32) -> (i32, i32) {
    %c0_i32 = arith.constant 0 : i32
    %c0_i32_0 = arith.constant 0 : i32
    return %c0_i32, %arg1 : i32, i32
  }
  func.func @transform_4(%arg0: i32, %arg1: i32) -> (i32, i32) {
    %c0_i32 = arith.constant 0 : i32
    return %arg0, %arg1 : i32, i32
  }
}

</mosaic_0001>

<bundles_post_ra>
// kernel: gpt2_forward.8
= control target key start
LH: loop header
LB: loop body
LE: loop exit
PB: predicated region body
PF: predicated region fallthrough
CT: control target
= control target key end

     0   :  { %s692_s12 = smov 0   ;;  %s694_s13 = smov 0   ;;  %s758_s0 = inlined_call_operand.vmem [shape: bf16[2,4,8,16], index: 0, kind: input, shape index: {}]   ;;  %s759_s1 = inlined_call_operand.vmem [shape: bf16[2,4,8,16], index: 1, kind: input, shape index: {}]   ;;  %s760_s2 = inlined_call_operand.vmem [shape: bf16[2,4,8,16], index: 2, kind: input, shape index: {}]   ;;  %s761_s3 = inlined_call_operand.vmem [shape: bf16[2,4,8,16], index: 3, kind: output, shape index: {}]  }
   0x1   :  { %s696_s14 = smov 0   ;;  %s698_s15 = smov 0  }
   0x2   :  { %s700_s16 = smov 0  }
   0x3 LB: > { %s28_s17 = sadd.s32 1, %s660_s14  ;;  %s32_s18 = sadd.s32 1, %s664_s15  ;;  %s668_s16 = sphi %s700_s16, %s13_s16   ;;  %s664_s15 = sphi %s698_s15, %s765_s15   ;;  %s660_s14 = sphi %s696_s14, %s764_s14   ;;  %s656_s13 = sphi %s694_s13, %s763_s13   ;;  %s652_s12 = sphi %s692_s12, %s762_s12  }
   0x4   : > { %p30_p0 = scmp.ge.s32.totalorder %s28_s17, 4  ;;  %p555_p1 = scmp.ge.s32.totalorder %s668_s16, 1 }
   0x5   : > { %p200_p2 = scmp.lt.s32.totalorder %s668_s16, 9 }
   0x6   : > { %s767_s17 = smov (%p30_p0, %s28_s17), 0  ;;  %s769_s18 = smov (!%p30_p0, %s32_s18), %s664_s15 }
   0x7   : > { %p201_p3 = pnand %p555_p1, %p200_p2  ;;  %p34_p4 = scmp.ge.s32.totalorder %s769_s18, 2 }
   0x8   : > { %p252_p5 = scmp.lt.s32.totalorder (!%p201_p3), %s656_s13, 1  ;;  %p254_p6 = scmp.lt.s32.totalorder (!%p201_p3), %s652_s12, 3  ;;  %v670_v0 = vmov (!%p201_p3), 0.0   ;;  %vm671_vm0 = vmmov (!%p201_p3), 0   ;;  %vm294_vm1 = vcmask (!%p201_p3), 130048   ;;  %v342_v4 = vlaneseq (!%p201_p3) }
   0x9   : > { %s771_s18 = smov (%p34_p4, %s769_s18), 0  ;;  %204 = sbr.rel (%p201_p3) target bundleno = 774 (0x306), region = 32 }
   0xa   : > { %572 = vmatprep.subr.bf16.mxu0 (!%p201_p3), %v670_v0  ;;  %574 = vmatprep.mubr.msk.bf16.mxu0 (!%p201_p3), %vm671_vm0, %v670_v0  ;;  %v343_v5 = vshrl.u32 (!%p201_p3), %v342_v4, 7  ;;  %v347_v6 = vand.u32 (!%p201_p3), 127, %v342_v4  ;;  %vm350_vm3 = vcmask (!%p201_p3), 64512   ;;  %vm366_vm4 = vcmask (!%p201_p3), 1043456  }
   0xb   : > { %578 = vmatprep.subr.bf16.mxu1 (!%p201_p3), %v670_v0  ;;  %580 = vmatprep.mubr.msk.bf16.mxu1 (!%p201_p3), %vm671_vm0, %v670_v0  ;;  %vm411_vm5 = vcmask (!%p201_p3), 125952  }
   0xc   : > { %vm348_vm2 = vcmp.gt.s32.totalorder (!%p201_p3), %v347_v6, %v343_v5 }
  0x10   : > { %s773_s13 = smov (!%p252_p5, %s656_s13), 1  ;;  %s775_s12 = smov (!%p254_p6, %s652_s12), 3 }
  0x11   : > { %s556_s19 = sshll.u32 %s773_s13, 2 }
  0x12   : > { %s260_s20 = sadd.s32 %s556_s19, %s775_s12 }
  0x13   : > { %s722_s21 = sshll.u32 %s260_s20, 2 }
  0x14   : > { %s270_s24 = scalar_lea.vmem %s759_s1, %s722_s21  ;;  %s262_s27 = scalar_lea.vmem %s758_s0, %s722_s21 }
  0x15   : > { %v292_v1 = vld [vmem:[%s270_s24] sm:$0xf]  ;;  %s278_s30 = scalar_lea.vmem %s760_s2, %s722_s21  ;;  %s289_s6 = scalar_lea.vmem %s761_s3, %s722_s21 }
  0x16   : > { %v299_v2 = vsel %vm294_vm1, %v292_v1, 0  ;;  %v291_v3 = vld [vmem:[%s262_s27] sm:$0xf] }
  0x17   : > { %573 = vmatpush3.bf16.xpose.msra.mxu0 %v299_v2  ;;  %v293_v18 = vld [vmem:[%s278_s30] sm:$0xf] }
  0x18   : > { %v368_v19 = vsel %vm366_vm4, %v293_v18, 0 }
  0x19   : > { %579 = vmatpush3.bf16.msra.mxu1 %v368_v19 }
  0x1e   : > { %575 = vmatmul.mubr.msk.bf16.vlgmr.msra.gmra.mrb[0].mxu0 %vm294_vm1, %v291_v3 }
  0xf1   : > { %v335_v7 = vpop.f32.mrb[0].mxu0 }
  0xf2   : > { %v349_v8 = vsel %vm348_vm2, -1e+30, %v335_v7  ;;  %v576_v9 = vpop.f32.mrb[1].mxu0 }
  0xf3   : > { %v338_v10 = vpop.f32.mrb[2].mxu0  ;;  %v351_v11 = vsel %vm350_vm3, %v349_v8, -inf }
  0xf4   : > { %352 = vmax.xlane.f32.xlu0 %v351_v11  ;;  %v577_v12 = vpop.f32.mrb[3].mxu0 }
 0x181   : > { %v353_v13 = vpop.xlane.xlu0 %352 }
 0x182   : > { %v354_v14 = vsub.f32 %v349_v8, %v353_v13 }
 0x184   : > { %v355_v15 = vmul.f32 1.442695, %v354_v14 }
 0x186   : > { %626 = vpow2.f32 %v355_v15 }
 0x190   : > { %v627_v16 = vpop.eup %626 }
 0x191   : > { %v357_v17 = vsel %vm350_vm3, %v627_v16, 0.0 }
 0x192   : > { %358 = vadd.xlane.f32.xlu0 %v357_v17 }
 0x21f   : > { %v359_v20 = vpop.xlane.xlu0 %358 }
 0x220   : > { %628 = vrcp.f32 %v359_v20 }
 0x22a   : > { %v629_v21 = vpop.eup %628 }
 0x22b   : > { %v361_v22 = vmul.f32 %v629_v21, %v627_v16 }
 0x22d   : > { %v362_v23 = vpack.c.bf16 %v361_v22, %v361_v22 }
 0x22f   : > { %581 = vmatmul.mubr.msk.bf16.vlgmr.msra.gmra.mrb[0].mxu1 %vm350_vm3, %v362_v23 }
 0x302   : > { %v404_v24 = vpop.f32.mrb[0].mxu1 }
 0x303   : > { %v410_v25 = vpack.c.bf16 %v404_v24, %v404_v24  ;;  %v582_v26 = vpop.f32.mrb[1].mxu1 }
 0x304   : > { %v407_v27 = vpop.f32.mrb[2].mxu1 }
 0x305   : > { %412 = vst.msk [vmem:[%s289_s6] sm:$0xf] %vm411_vm5, %v410_v25  ;;  %v583_v28 = vpop.f32.mrb[3].mxu1 }
 0x306 PF: > { %s13_s16 = sadd.s32 1, %s668_s16   ;;  %s762_s12 = smov %s660_s14 }
 0x307   : > { %p10_p7 = scmp.ge.s32.totalorder %s13_s16, 10   ;;  %s763_s13 = smov %s664_s15 }
 0x308   : > { %s764_s14 = smov %s767_s17  ;;  %s765_s15 = smov %s771_s18 }
 0x309   :  { %12 = sbr.rel (!%p10_p7) target bundleno = 3 (0x3), region = 68 }

// kernel: gpt2_forward.7
= control target key start
LH: loop header
LB: loop body
LE: loop exit
PB: predicated region body
PF: predicated region fallthrough
CT: control target
= control target key end

     0   :  { %vm25_vm0 = vcmask 523264   ;;  %v229_v22 = vmov 0   ;;  %v80_v40 = vlaneseq  ;;  %vm188_vm1 = vcmask 1043456   ;;  %s310_s0 = inlined_call_operand.vmem [shape: f32[16,64], index: 0, kind: input, shape index: {}]   ;;  %s311_s3 = inlined_call_operand.vmem [shape: bf16[64,192], index: 3, kind: input, shape index: {}]   ;;  %s312_s1 = inlined_call_operand.vmem [shape: f32[1,64], index: 1, kind: input, shape index: {}]   ;;  %s313_s2 = inlined_call_operand.vmem [shape: f32[1,64], index: 2, kind: input, shape index: {}]   ;;  %s314_s4 = inlined_call_operand.vmem [shape: f32[1,192], index: 4, kind: input, shape index: {}]   ;;  %s315_s5 = inlined_call_operand.vmem [shape: bf16[16,192], index: 5, kind: output, shape index: {}]  }
   0x1   :  { %v21_v0 = vld [vmem:[%s310_s0] sm:$0xff]  ;;  %v22_v1 = vld [vmem:[%s310_s0 + $0x8] sm:$0xff]  ;;  %v216_v16 = vld [vmem:[%s311_s3 + $0x14] ss:$8 sps:$4 sm:$0xff]   ;;  %165 = vmatprep.mubr.bf16.mxu0 %v229_v22  ;;  %vm189_vm2 = vcmask 523268  }
   0x2   :  { %v26_v2 = vsel %vm25_vm0, %v21_v0, 0.0  ;;  %v29_v3 = vsel %vm25_vm0, %v22_v1, 0.0  ;;  %v213_v14 = vld [vmem:[%s311_s3 + $0x4] ss:$8 sps:$4 sm:$0xff]   ;;  %v215_v15 = vld [vmem:[%s311_s3] ss:$8 sps:$4 sm:$0xff]   ;;  %vm190_vm3 = vmor %vm189_vm2, %vm188_vm1 }
   0x3   :  { %27 = vadd.xlane.f32.xlu0 %v26_v2  ;;  %133 = vmatprep.subr.bf16.mxu0 %v213_v14  ;;  %v218_v17 = vld [vmem:[%s311_s3 + $0x10] ss:$8 sps:$4 sm:$0xff]   ;;  %v219_v18 = vld [vmem:[%s311_s3 + $0x24] ss:$8 sps:$4 sm:$0xff]   ;;  %v221_v19 = vld [vmem:[%s311_s3 + $0x20] ss:$8 sps:$4 sm:$0xff]  }
   0x4   :  { %134 = vmatpush1.bf16.msra.mxu0 %v215_v15  ;;  %v222_v20 = vld [vmem:[%s311_s3 + $0x34] ss:$8 sps:$4 sm:$0xff]   ;;  %v224_v21 = vld [vmem:[%s311_s3 + $0x30] ss:$8 sps:$4 sm:$0xff]   ;;  %v197_v31 = vld [vmem:[%s312_s1] ss:$0 sm:$0xff] }
   0x5   :  { %135 = vmatprep.subr.bf16.mxu0 %v216_v16  ;;  %v198_v35 = vld [vmem:[%s313_s2] ss:$0 sm:$0xff]  ;;  %v81_v41 = vshrl.u32 %v80_v40, 7 }
   0x6   :  { %v78_v43 = vld [vmem:[%s314_s4] sm:$0x3] }
   0x7   :  { %30 = vadd.xlane.f32.xlu0 %v29_v3  ;;  %v82_v42 = vsub.s32 0, %v81_v41  ;;  %v86_v44 = vsub.s32 1, %v81_v41 }
   0x8   :  { %136 = vmatpush1.bf16.msra.mxu0 %v218_v17 }
   0x9   :  { %137 = vmatprep.subr.bf16.mxu0 %v219_v18  ;;  %v83_v45 = vrot.slane %v78_v43, %v82_v42  ;;  %v87_v46 = vrot.slane %v78_v43, %v86_v44 }
   0xc   :  { %138 = vmatpush1.bf16.msra.mxu0 %v221_v19 }
   0xd   :  { %139 = vmatprep.subr.bf16.mxu0 %v222_v20 }
  0x10   :  { %140 = vmatpush1.bf16.msra.mxu0 %v224_v21 }
  0x90   :  { %v28_v4 = vpop.xlane.xlu0 %27 }
  0x91   :  { %v33_v5 = vmul.f32 0.015625, %v28_v4 }
  0x93   :  { %v35_v6 = vsub.f32 %v21_v0, %v33_v5 }
  0x94   :  { %v31_v7 = vpop.xlane.xlu0 %30 }
  0x95   :  { %v34_v8 = vmul.f32 0.015625, %v31_v7  ;;  %v37_v9 = vmul.f32 %v35_v6, %v35_v6 }
  0x97   :  { %v36_v10 = vsub.f32 %v22_v1, %v34_v8  ;;  %v39_v11 = vsel %vm25_vm0, %v37_v9, 0.0 }
  0x98   :  { %40 = vadd.xlane.f32.xlu1 %v39_v11 }
  0x99   :  { %v38_v12 = vmul.f32 %v36_v10, %v36_v10 }
  0x9b   :  { %v42_v13 = vsel %vm25_vm0, %v38_v12, 0.0 }
  0x9c   :  { %43 = vadd.xlane.f32.xlu1 %v42_v13 }
 0x125   :  { %v41_v23 = vpop.xlane.xlu1 %40 }
 0x126   :  { %v45_v24 = vmul.f32 0.015625, %v41_v23 }
 0x128   :  { %v47_v25 = vadd.f32 1e-05, %v45_v24 }
 0x129   :  { %v44_v26 = vpop.xlane.xlu1 %43 }
 0x12a   :  { %225 = vrsqrt.f32 %v47_v25  ;;  %v46_v27 = vmul.f32 0.015625, %v44_v26 }
 0x12c   :  { %v48_v28 = vadd.f32 1e-05, %v46_v27 }
 0x12e   :  { %227 = vrsqrt.f32 %v48_v28 }
 0x134   :  { %v226_v29 = vpop.eup %225 }
 0x135   :  { %v51_v30 = vmul.f32 %v226_v29, %v35_v6 }
 0x137   :  { %v59_v34 = vmul.f32 %v197_v31, %v51_v30 }
 0x138   :  { %v228_v32 = vpop.eup %227 }
 0x139   :  { %v52_v33 = vmul.f32 %v228_v32, %v36_v10  ;;  %v67_v37 = vadd.f32 %v198_v35, %v59_v34 }
 0x13b   :  { %v60_v36 = vmul.f32 %v197_v31, %v52_v33 }
 0x13d   :  { %v68_v38 = vadd.f32 %v198_v35, %v60_v36 }
 0x13f   :  { %v69_v39 = vpack.c.bf16 %v68_v38, %v67_v37 }
 0x141   :  { %207 = vmatmul.mubr.msk.bf16.vlgmr.msra.gmra.mrb[0].mxu0 %vm25_vm0, %v69_v39 }
 0x214   :  { %v167_v47 = vpop.f32.mrb[0].mxu0 }
 0x215   :  { %v168_v48 = vadd.f32 %v167_v47, %v83_v45  ;;  %v169_v49 = vpop.f32.mrb[1].mxu0 }
 0x216   :  { %v170_v50 = vadd.f32 %v169_v49, %v87_v46  ;;  %v171_v51 = vpop.f32.mrb[2].mxu0 }
 0x217   :  { %v172_v52 = vadd.f32 %v171_v51, %v83_v45  ;;  %v173_v53 = vpop.f32.mrb[3].mxu0 }
 0x218   :  { %v210_v54 = vpack.c.bf16 %v170_v50, %v168_v48  ;;  %v174_v55 = vadd.f32 %v173_v53, %v87_v46 }
 0x21a   :  { %191 = vst.msk [vmem:[%s315_s5] sm:$0xff] %vm190_vm3, %v210_v54  ;;  %v211_v56 = vpack.c.bf16 %v174_v55, %v172_v52 }
 0x21c   :  { %192 = vst.msk [vmem:[%s315_s5 + $0x8] sm:$0xff] %vm190_vm3, %v211_v56 }

// kernel: gpt2_forward.13
= control target key start
LH: loop header
LB: loop body
LE: loop exit
PB: predicated region body
PF: predicated region fallthrough
CT: control target
= control target key end

     0   :  { %vm23_vm0 = vcmask 523264   ;;  %s319_s0 = inlined_call_operand.vmem [shape: f32[16,64], index: 0, kind: input, shape index: {}]   ;;  %s320_s1 = inlined_call_operand.vmem [shape: f32[1,64], index: 1, kind: input, shape index: {}]   ;;  %s321_s2 = inlined_call_operand.vmem [shape: f32[1,64], index: 2, kind: input, shape index: {}]   ;;  %s322_s3 = inlined_call_operand.vmem [shape: bf16[64,256], index: 3, kind: input, shape index: {}]   ;;  %s323_s4 = inlined_call_operand.hbm [shape: f32[16,256], index: 4, kind: output, shape index: {}]  }
   0x1   :  { %v19_v0 = vld [vmem:[%s319_s0] sm:$0xff]  ;;  %v20_v1 = vld [vmem:[%s319_s0 + $0x8] sm:$0xff] }
   0x2   :  { %v24_v2 = vsel %vm23_vm0, %v19_v0, 0.0  ;;  %v27_v3 = vsel %vm23_vm0, %v20_v1, 0.0 }
   0x3   :  { %25 = vadd.xlane.f32.xlu0 %v24_v2 }
   0x4   :  { %9 = vsyncpa [#allocation3], 0  ;;  %v197_v14 = vld [vmem:[%s322_s3 + $0x4] ss:$8 sps:$4 sm:$0xff]   ;;  %v199_v15 = vld [vmem:[%s322_s3] ss:$8 sps:$4 sm:$0xff]  }
   0x5   :  { %119 = vmatprep.subr.bf16.mxu0 %v197_v14  ;;  %v200_v16 = vld [vmem:[%s322_s3 + $0x14] ss:$8 sps:$4 sm:$0xff]   ;;  %v202_v17 = vld [vmem:[%s322_s3 + $0x10] ss:$8 sps:$4 sm:$0xff]   ;;  %v203_v18 = vld [vmem:[%s322_s3 + $0x24] ss:$8 sps:$4 sm:$0xff]  }
   0x6   :  { %120 = vmatpush1.bf16.msra.mxu0 %v199_v15  ;;  %v205_v19 = vld [vmem:[%s322_s3 + $0x20] ss:$8 sps:$4 sm:$0xff]   ;;  %v206_v20 = vld [vmem:[%s322_s3 + $0x34] ss:$8 sps:$4 sm:$0xff]   ;;  %v208_v21 = vld [vmem:[%s322_s3 + $0x30] ss:$8 sps:$4 sm:$0xff]  }
   0x7   :  { %28 = vadd.xlane.f32.xlu0 %v27_v3  ;;  %121 = vmatprep.subr.bf16.mxu0 %v200_v16  ;;  %v237_v22 = vmov 0   ;;  %v182_v31 = vld [vmem:[%s320_s1] ss:$0 sm:$0xff]  ;;  %s238_s11 = smov [#allocation2]  }
   0x8   :  { %151 = vmatprep.mubr.bf16.mxu0 %v237_v22  ;;  %v183_v35 = vld [vmem:[%s321_s2] ss:$0 sm:$0xff]  ;;  %s171_s12 = sshll.u32 %s238_s11, 4  ;;  %s172_s12 = int_to_ptr.vmem [resolvable:$true] %s171_s12 }
   0x9   :  { %s213_s1 = scalar_lea.vmem %s172_s12, 512  ;;  %p218_p1 = scmp.lt.s32.totalorder %s172_s12, %s172_s12 }
   0xa   :  { %122 = vmatpush1.bf16.msra.mxu0 %v202_v17  ;;  %p214_p0 = scmp.ne.s32.totalorder %s172_s12, %s213_s1  ;;  %p219_p2 = scmp.lt.s32.totalorder %s213_s1, %s213_s1 }
   0xb   :  { %123 = vmatprep.subr.bf16.mxu0 %v203_v18 }
   0xc   :  { %p220_p3 = por %p219_p2, %p218_p1 }
   0xe   :  { %124 = vmatpush1.bf16.msra.mxu0 %v205_v19  ;;  %p221_p4 = pnand %p220_p3, %p214_p0 }
   0xf   :  { %125 = vmatprep.subr.bf16.mxu0 %v206_v20 }
  0x12   :  { %126 = vmatpush1.bf16.msra.mxu0 %v208_v21 }
  0x90   :  { %v26_v4 = vpop.xlane.xlu0 %25 }
  0x91   :  { %v31_v5 = vmul.f32 0.015625, %v26_v4 }
  0x93   :  { %v33_v6 = vsub.f32 %v19_v0, %v31_v5 }
  0x94   :  { %v29_v7 = vpop.xlane.xlu0 %28 }
  0x95   :  { %v32_v8 = vmul.f32 0.015625, %v29_v7  ;;  %v35_v9 = vmul.f32 %v33_v6, %v33_v6 }
  0x97   :  { %v34_v10 = vsub.f32 %v20_v1, %v32_v8  ;;  %v37_v11 = vsel %vm23_vm0, %v35_v9, 0.0 }
  0x98   :  { %38 = vadd.xlane.f32.xlu1 %v37_v11 }
  0x99   :  { %v36_v12 = vmul.f32 %v34_v10, %v34_v10 }
  0x9b   :  { %v40_v13 = vsel %vm23_vm0, %v36_v12, 0.0 }
  0x9c   :  { %41 = vadd.xlane.f32.xlu1 %v40_v13 }
 0x125   :  { %v39_v23 = vpop.xlane.xlu1 %38 }
 0x126   :  { %v43_v24 = vmul.f32 0.015625, %v39_v23 }
 0x128   :  { %v45_v25 = vadd.f32 1e-05, %v43_v24 }
 0x129   :  { %v42_v26 = vpop.xlane.xlu1 %41 }
 0x12a   :  { %209 = vrsqrt.f32 %v45_v25  ;;  %v44_v27 = vmul.f32 0.015625, %v42_v26 }
 0x12c   :  { %v46_v28 = vadd.f32 1e-05, %v44_v27 }
 0x12e   :  { %211 = vrsqrt.f32 %v46_v28 }
 0x134   :  { %v210_v29 = vpop.eup %209 }
 0x135   :  { %v49_v30 = vmul.f32 %v210_v29, %v33_v6 }
 0x137   :  { %v57_v34 = vmul.f32 %v182_v31, %v49_v30 }
 0x138   :  { %v212_v32 = vpop.eup %211 }
 0x139   :  { %v50_v33 = vmul.f32 %v212_v32, %v34_v10  ;;  %v65_v37 = vadd.f32 %v183_v35, %v57_v34 }
 0x13b   :  { %v58_v36 = vmul.f32 %v182_v31, %v50_v33 }
 0x13d   :  { %v66_v38 = vadd.f32 %v183_v35, %v58_v36 }
 0x13f   :  { %v67_v39 = vpack.c.bf16 %v66_v38, %v65_v37 }
 0x141   :  { %192 = vmatmul.mubr.msk.bf16.vlgmr.msra.gmra.mrb[0].mxu0 %vm23_vm0, %v67_v39 }
 0x214   :  { %v153_v40 = vpop.f32.mrb[0].mxu0 }
 0x215   :  { %162 = vst [vmem:[#allocation2] sm:$0xff] %v153_v40  ;;  %v155_v41 = vpop.f32.mrb[1].mxu0 }
 0x216   :  { %163 = vst [vmem:[#allocation2 + $0x8] sm:$0xff] %v155_v41  ;;  %v157_v42 = vpop.f32.mrb[2].mxu0 }
 0x217   :  { %164 = vst [vmem:[#allocation2 + $0x10] sm:$0xff] %v157_v42  ;;  %v159_v43 = vpop.f32.mrb[3].mxu0 }
 0x218   :  { %165 = vst [vmem:[#allocation2 + $0x18] sm:$0xff] %v159_v43 }
 0x219   :  { %224 = shalt.err (!%p221_p4)
}
 0x21a   :  { %s225_s14 = scalar_lea.hbm %s323_s4, 512 }
 0x21b   :  { %p226_p5 = scmp.ne.s32.totalorder %s323_s4, %s225_s14  ;;  %p229_p6 = scmp.lt.u32.totalorder %s225_s14, %s323_s4 }
 0x21d   :  { %p231_p7 = pnand %p229_p6, %p226_p5 }
 0x21f   :  { %234 = shalt.err (!%p231_p7)
}
 0x220   :  { %s239_s0 = smov 256   ;;  %s240_s19 = smov 16  }
 0x221   :  { %177 = dma.vmem_to_hbm [thread:$0]  %s172_s12, 512, %s323_s4, [#allocation3], %s239_s0, %s239_s0, %s240_s19  }
 0x222   :  { %235 = dma.done.wait [#allocation3], 512  }
 0x223   :  { %236 = vsyncadd [#allocation3], 4294966784 }
 0x224   :  { %181 = vsyncpa [#allocation3], 1 }

// kernel: gpt2_forward.9
= control target key start
LH: loop header
LB: loop body
LE: loop exit
PB: predicated region body
PF: predicated region fallthrough
CT: control target
= control target key end

     0   :  { %v515_v0 = vmov 0.0   ;;  %vm516_vm0 = vmmov 0   ;;  %vm77_vm1 = vcmask 523264   ;;  %s690_s2 = inlined_call_operand.vmem [shape: bf16[64,64], index: 2, kind: input, shape index: {}]   ;;  %s691_s1 = inlined_call_operand.vmem [shape: bf16[16,64], index: 1, kind: input, shape index: {}]   ;;  %s692_s0 = inlined_call_operand.vmem [shape: f32[16,64], index: 0, kind: input, shape index: {}]   ;;  %s693_s3 = inlined_call_operand.vmem [shape: f32[1,64], index: 3, kind: input, shape index: {}]   ;;  %s694_s6 = inlined_call_operand.vmem [shape: bf16[64,128], index: 6, kind: input, shape index: {}]   ;;  %s695_s4 = inlined_call_operand.vmem [shape: f32[1,64], index: 4, kind: input, shape index: {}]   ;;  %s696_s5 = inlined_call_operand.vmem [shape: f32[1,64], index: 5, kind: input, shape index: {}]   ;;  %s697_s8 = inlined_call_operand.vmem [shape: bf16[128,64], index: 8, kind: input, shape index: {}]   ;;  %s698_s7 = inlined_call_operand.vmem [shape: f32[1,128], index: 7, kind: input, shape index: {}]   ;;  %s699_s9 = inlined_call_operand.vmem [shape: f32[1,64], index: 9, kind: input, shape index: {}]   ;;  %s700_s10 = inlined_call_operand.vmem [shape: f32[16,64], index: 10, kind: output, shape index: {}]  }
   0x1   :  { %444 = vmatprep.subr.bf16.mxu1 %v515_v0  ;;  %v490_v1 = vld [vmem:[%s690_s2] sm:$0xff]   ;;  %452 = vmatprep.mubr.msk.bf16.mxu1 %vm516_vm0, %v515_v0  ;;  %v491_v2 = vld [vmem:[%s690_s2 + $0x8] sm:$0xff]   ;;  %v492_v3 = vld [vmem:[%s690_s2 + $0x10] sm:$0xff]  }
   0x2   :  { %468 = vmatprep.subr.bf16.mxu0 %v515_v0  ;;  %484 = vmatprep.mubr.msk.bf16.mxu0 %vm516_vm0, %v515_v0  ;;  %v493_v4 = vld [vmem:[%s690_s2 + $0x18] sm:$0xff]   ;;  %v494_v5 = vld [vmem:[%s691_s1] sm:$0xff]   ;;  %v37_v9 = vld [vmem:[%s692_s0 + $0x8] sm:$0xff] }
   0x3   :  { %445 = vmatpush3.bf16.msra.mxu1 %v490_v1  ;;  %v36_v6 = vld [vmem:[%s692_s0] sm:$0xff]  ;;  %v496_v30 = vld [vmem:[%s694_s6 + $0x8] sm:$0xff]   ;;  %v497_v31 = vld [vmem:[%s694_s6 + $0x10] sm:$0xff]  }
   0x4   :  { %446 = vmatprep.subr.bf16.mxu1 %v515_v0  ;;  %v407_v8 = vld [vmem:[%s693_s3] ss:$0 sm:$0xff]  ;;  %v498_v32 = vld [vmem:[%s694_s6 + $0x18] sm:$0xff]   ;;  %v500_v51 = vld [vmem:[%s697_s8 + $0x8] sm:$0xff]  }
   0x5   :  { %v495_v29 = vld [vmem:[%s694_s6] sm:$0xff]   ;;  %v501_v52 = vld [vmem:[%s697_s8 + $0x10] sm:$0xff]   ;;  %v502_v53 = vld [vmem:[%s697_s8 + $0x18] sm:$0xff]  }
   0x6   :  { %v408_v41 = vld [vmem:[%s695_s4] ss:$0 sm:$0xff]  ;;  %v504_v55 = vld [vmem:[%s697_s8 + $0x28] sm:$0xff]   ;;  %v505_v56 = vld [vmem:[%s697_s8 + $0x30] sm:$0xff]  }
   0x7   :  { %447 = vmatpush3.bf16.msra.mxu1 %v491_v2  ;;  %v409_v45 = vld [vmem:[%s696_s5] ss:$0 sm:$0xff]  ;;  %v506_v57 = vld [vmem:[%s697_s8 + $0x38] sm:$0xff]  }
   0x8   :  { %448 = vmatprep.subr.bf16.mxu1 %v515_v0  ;;  %v499_v50 = vld [vmem:[%s697_s8] sm:$0xff]  }
   0x9   :  { %469 = vmatpush3.bf16.msra.mxu0 %v499_v50  ;;  %v503_v54 = vld [vmem:[%s697_s8 + $0x20] sm:$0xff]  }
   0xa   :  { %470 = vmatprep.subr.bf16.mxu0 %v515_v0  ;;  %v410_v58 = vld [vmem:[%s698_s7] ss:$0 sm:$0xff] }
   0xb   :  { %449 = vmatpush3.bf16.msra.mxu1 %v492_v3 }
   0xc   :  { %450 = vmatprep.subr.bf16.mxu1 %v515_v0 }
   0xd   :  { %471 = vmatpush3.bf16.msra.mxu0 %v500_v51 }
   0xe   :  { %472 = vmatprep.subr.bf16.mxu0 %v515_v0 }
   0xf   :  { %451 = vmatpush3.bf16.msra.mxu1 %v493_v4 }
  0x10   :  { %456 = vmatprep.subr.bf16.mxu1 %v515_v0 }
  0x11   :  { %473 = vmatpush3.bf16.msra.mxu0 %v501_v52 }
  0x12   :  { %453 = vmatmul.mubr.msk.bf16.vlgmr.msra.gmra.mrb[0].mxu1 %vm77_vm1, %v494_v5  ;;  %474 = vmatprep.subr.bf16.mxu0 %v515_v0 }
  0x13   :  { %464 = vmatprep.mubr.msk.bf16.mxu1 %vm516_vm0, %v515_v0  ;;  %457 = vmatpush3.bf16.msra.mxu1 %v495_v29 }
  0x14   :  { %458 = vmatprep.subr.bf16.mxu1 %v515_v0 }
  0x15   :  { %475 = vmatpush3.bf16.msra.mxu0 %v502_v53 }
  0x16   :  { %476 = vmatprep.subr.bf16.mxu0 %v515_v0 }
  0x17   :  { %459 = vmatpush3.bf16.msra.mxu1 %v496_v30 }
  0x18   :  { %460 = vmatprep.subr.bf16.mxu1 %v515_v0 }
  0x19   :  { %477 = vmatpush3.bf16.msra.mxu0 %v503_v54 }
  0x1a   :  { %478 = vmatprep.subr.bf16.mxu0 %v515_v0 }
  0x1b   :  { %461 = vmatpush3.bf16.msra.mxu1 %v497_v31 }
  0x1c   :  { %462 = vmatprep.subr.bf16.mxu1 %v515_v0 }
  0x1d   :  { %479 = vmatpush3.bf16.msra.mxu0 %v504_v55 }
  0x1e   :  { %480 = vmatprep.subr.bf16.mxu0 %v515_v0 }
  0x1f   :  { %463 = vmatpush3.bf16.msra.mxu1 %v498_v32 }
  0x21   :  { %481 = vmatpush3.bf16.msra.mxu0 %v505_v56 }
  0x22   :  { %482 = vmatprep.subr.bf16.mxu0 %v515_v0 }
  0x25   :  { %483 = vmatpush3.bf16.msra.mxu0 %v506_v57 }
  0xe5   :  { %v115_v7 = vpop.f32.mrb[0].mxu1 }
  0xe6   :  { %v122_v10 = vadd.f32 %v115_v7, %v36_v6  ;;  %v454_v11 = vpop.f32.mrb[1].mxu1 }
  0xe7   :  { %v118_v12 = vpop.f32.mrb[2].mxu1 }
  0xe8   :  { %v609_v13 = vadd.f32 %v407_v8, %v122_v10  ;;  %v123_v14 = vadd.f32 %v118_v12, %v37_v9  ;;  %v455_v15 = vpop.f32.mrb[3].mxu1 }
  0xea   :  { %v611_v16 = vadd.f32 %v407_v8, %v123_v14  ;;  %v135_v17 = vsel %vm77_vm1, %v609_v13, 0.0 }
  0xeb   :  { %136 = vadd.xlane.f32.xlu0 %v135_v17 }
  0xec   :  { %v138_v18 = vsel %vm77_vm1, %v611_v16, 0.0 }
  0xef   :  { %139 = vadd.xlane.f32.xlu0 %v138_v18 }
 0x178   :  { %v137_v19 = vpop.xlane.xlu0 %136 }
 0x179   :  { %v142_v20 = vmul.f32 0.015625, %v137_v19 }
 0x17b   :  { %v144_v21 = vsub.f32 %v609_v13, %v142_v20 }
 0x17c   :  { %v140_v22 = vpop.xlane.xlu0 %139 }
 0x17d   :  { %v143_v23 = vmul.f32 0.015625, %v140_v22  ;;  %v146_v24 = vmul.f32 %v144_v21, %v144_v21  ;;  %v416_v22 = vld [vmem:[%s699_s9] ss:$0 sm:$0xff] }
 0x17f   :  { %v145_v25 = vsub.f32 %v611_v16, %v143_v23  ;;  %v148_v26 = vsel %vm77_vm1, %v146_v24, 0.0 }
 0x180   :  { %149 = vadd.xlane.f32.xlu1 %v148_v26 }
 0x181   :  { %v147_v27 = vmul.f32 %v145_v25, %v145_v25 }
 0x183   :  { %v151_v28 = vsel %vm77_vm1, %v147_v27, 0.0 }
 0x184   :  { %152 = vadd.xlane.f32.xlu1 %v151_v28 }
 0x20d   :  { %v150_v33 = vpop.xlane.xlu1 %149 }
 0x20e   :  { %v154_v34 = vmul.f32 0.015625, %v150_v33 }
 0x210   :  { %v156_v35 = vadd.f32 1e-05, %v154_v34 }
 0x211   :  { %v153_v36 = vpop.xlane.xlu1 %152 }
 0x212   :  { %507 = vrsqrt.f32 %v156_v35  ;;  %v155_v37 = vmul.f32 0.015625, %v153_v36 }
 0x214   :  { %v157_v38 = vadd.f32 1e-05, %v155_v37 }
 0x216   :  { %509 = vrsqrt.f32 %v157_v38 }
 0x21c   :  { %v508_v39 = vpop.eup %507 }
 0x21d   :  { %v160_v40 = vmul.f32 %v508_v39, %v144_v21 }
 0x21f   :  { %v168_v43 = vmul.f32 %v408_v41, %v160_v40 }
 0x220   :  { %v510_v42 = vpop.eup %509 }
 0x221   :  { %v161_v44 = vmul.f32 %v510_v42, %v145_v25  ;;  %v176_v47 = vadd.f32 %v409_v45, %v168_v43 }
 0x223   :  { %v169_v46 = vmul.f32 %v408_v41, %v161_v44 }
 0x225   :  { %v177_v48 = vadd.f32 %v409_v45, %v169_v46 }
 0x227   :  { %v178_v49 = vpack.c.bf16 %v177_v48, %v176_v47 }
 0x229   :  { %465 = vmatmul.mubr.msk.bf16.vlgmr.msra.gmra.mrb[4].mxu1 %vm77_vm1, %v178_v49 }
 0x2fc   :  { %v255_v59 = vpop.f32.mrb[4].mxu1 }
 0x2fd   :  { %v256_v60 = vadd.f32 %v410_v58, %v255_v59  ;;  %v466_v61 = vpop.f32.mrb[5].mxu1 }
 0x2fe   :  { %v258_v62 = vpop.f32.mrb[6].mxu1 }
 0x2ff   :  { %v262_v63 = vmul.f32 %v256_v60, %v256_v60  ;;  %v259_v1 = vadd.f32 %v410_v58, %v258_v62  ;;  %v467_v2 = vpop.f32.mrb[7].mxu1 }
 0x301   :  { %v264_v3 = vmul.f32 %v262_v63, %v256_v60  ;;  %v263_v4 = vmul.f32 %v259_v1, %v259_v1 }
 0x303   :  { %v266_v5 = vmul.f32 0.044715, %v264_v3  ;;  %v265_v6 = vmul.f32 %v263_v4, %v259_v1 }
 0x305   :  { %v268_v7 = vadd.f32 %v266_v5, %v256_v60  ;;  %v267_v8 = vmul.f32 0.044715, %v265_v6 }
 0x307   :  { %v270_v9 = vmul.f32 0.7978846, %v268_v7  ;;  %v269_v0 = vadd.f32 %v267_v8, %v259_v1 }
 0x309   :  { %511 = vtanh.f32 %v270_v9  ;;  %v271_v10 = vmul.f32 0.7978846, %v269_v0 }
 0x30b   :  { %513 = vtanh.f32 %v271_v10 }
 0x313   :  { %v512_v11 = vpop.eup %511 }
 0x314   :  { %v274_v12 = vadd.f32 1.0, %v512_v11 }
 0x315   :  { %v514_v14 = vpop.eup %513 }
 0x316   :  { %v275_v15 = vadd.f32 1.0, %v514_v14  ;;  %v276_v17 = vmul.f32 0.5, %v274_v12 }
 0x318   :  { %v277_v18 = vmul.f32 0.5, %v275_v15  ;;  %v278_v19 = vmul.f32 %v276_v17, %v256_v60 }
 0x31a   :  { %v279_v20 = vmul.f32 %v277_v18, %v259_v1 }
 0x31c   :  { %v280_v21 = vpack.c.bf16 %v279_v20, %v278_v19 }
 0x31e   :  { %485 = vmatmul.mubr.bf16.vlgmr.msra.gmra.mrb[0].mxu0 %v280_v21 }
 0x3f1   :  { %v386_v23 = vpop.f32.mrb[0].mxu0 }
 0x3f2   :  { %v387_v24 = vadd.f32 %v416_v22, %v386_v23  ;;  %v486_v25 = vpop.f32.mrb[1].mxu0 }
 0x3f3   :  { %v389_v26 = vpop.f32.mrb[2].mxu0 }
 0x3f4   :  { %v393_v27 = vadd.f32 %v387_v24, %v609_v13  ;;  %v390_v28 = vadd.f32 %v416_v22, %v389_v26  ;;  %v487_v29 = vpop.f32.mrb[3].mxu0 }
 0x3f6   :  { %395 = vst.msk [vmem:[%s700_s10] sm:$0xff] %vm77_vm1, %v393_v27  ;;  %v394_v30 = vadd.f32 %v390_v28, %v611_v16 }
 0x3f8   :  { %396 = vst.msk [vmem:[%s700_s10 + $0x8] sm:$0xff] %vm77_vm1, %v394_v30 }

</bundles_post_ra>
